<compile_context>
chip_gen: v7x
topology: tpu7x:2x2x1
jax: 0.10.0
libtpu: 0.0.40
codegen_flags: <defaults>
</compile_context>

<pallas_src>
import functools

import jax
import jax.numpy as jnp
import numpy as np
from jax import lax
from jax.experimental import pallas as pl
from jax.experimental.pallas import tpu as pltpu


# ----------------------------------------------------------------------------
# Fused kernel: conv(3x3) + pixel shuffle + BN batch-stats + BN affine + ReLU.
#   p_ref    : (1, KP, M)     im2col patches (upsampled to output grid) for batch n
#   w_ref    : (RR*C, KP)     weights, row = parity_class*C + out_channel (bias = last K row)
#   mask_ref : (RR, M)        f32 lane masks selecting each parity class's output pixels
#   g_ref    : (C, 1)         gamma
#   b_ref    : (C, 1)         beta
#   o_ref    : (N, C, M)      full output, VMEM-resident across the grid
#   zb_ref   : (RR*C, M)      f32 scratch holding the batched matmul result
#   sum_ref, ssq_ref : (C, 1) f32 scratch accumulators for BN statistics
# ----------------------------------------------------------------------------
def _fused_kernel(p_ref, w_ref, mask_ref, g_ref, b_ref, o_ref,
                  zb_ref, sum_ref, ssq_ref, *, rr, cout, nsteps, count, eps):
    n = pl.program_id(0)

    @pl.when(n == 0)
    def _init():
        sum_ref[...] = jnp.zeros_like(sum_ref)
        ssq_ref[...] = jnp.zeros_like(ssq_ref)

    patches = p_ref[0]                                     # (KP, M)

    # Conv(3x3) for ALL r*r pixel-shuffle parity classes in ONE MXU matmul:
    #   (RR*C, KP) @ (KP, M) -> (RR*C, M), f32 accumulation; bias folded via the ones row.
    # The patch operand is pushed into the MXU once and reused by every parity class.
    zb_ref[...] = jnp.dot(w_ref[...], patches, preferred_element_type=jnp.float32)

    # Pixel shuffle: parity class ij owns output lanes with (ho%r)*r + (wo%r) == ij.
    # Static C-row Ref slices of the staged result, lane-masked into place (no relayouts).
    z = zb_ref[0:cout, :] * mask_ref[0:1, :]
    for ij in range(1, rr):                                # static unroll (rr = r*r)
        z = z + zb_ref[ij * cout:(ij + 1) * cout, :] * mask_ref[ij:ij + 1, :]

    # Stash the pre-BN activation in the resident output block (normalized at the last step).
    o_ref[n] = z.astype(o_ref.dtype)

    # BN training-mode batch statistics, accumulated across the batch grid axis.
    sum_ref[...] += jnp.sum(z, axis=1, keepdims=True)      # (C, 1)
    ssq_ref[...] += jnp.sum(z * z, axis=1, keepdims=True)  # (C, 1)

    @pl.when(n == nsteps - 1)
    def _finalize():
        inv = 1.0 / count
        mean = sum_ref[...] * inv                          # (C, 1)
        var = jnp.maximum(ssq_ref[...] * inv - mean * mean, 0.0)
        scale = g_ref[...] * lax.rsqrt(var + eps)          # (C, 1)
        shift = b_ref[...] - mean * scale                  # (C, 1)
        zall = o_ref[...].astype(jnp.float32)              # (N, C, M), all resident in VMEM
        y = zall * scale[None, :, :] + shift[None, :, :]
        o_ref[...] = jnp.maximum(y, 0.0).astype(o_ref.dtype)


# ----------------------------------------------------------------------------
# Wrapper: NCHW in / NCHW out, matching PyTorch PixelShuffleUp.forward.
# ----------------------------------------------------------------------------
@functools.partial(jax.jit, static_argnames=("upscale", "eps", "compute_dtype"))
def pixel_shuffle_up(x_nchw, w_oihw, bias, gamma, beta, *, upscale=2, eps=1e-5,
                     compute_dtype=jnp.float32):
    N, Cin, H, W = x_nchw.shape
    r = upscale
    Cout_total = w_oihw.shape[0]                 # out_ch * r^2
    C = Cout_total // (r * r)                    # out_ch
    Ho, Wo = H * r, W * r
    M = Ho * Wo                                  # flattened output spatial (lane axis)
    K = 9 * Cin
    KP = K + 1                                   # + ones-row for the conv bias
    RR = r * r

    # ---- weights -> (RR*C, KP): row = ij*C + c, where conv channel cout = c*RR + ij ----
    wt = jnp.transpose(w_oihw.astype(jnp.float32), (2, 3, 1, 0))   # (3,3,Cin,Cout_total)
    wt = wt.reshape(K, C, RR)                                      # k=(ky,kx,cin); cout=(c,ij)
    wt = jnp.transpose(wt, (2, 1, 0)).reshape(RR * C, K)           # (RR*C, K), row = ij*C + c
    wb = jnp.transpose(bias.astype(jnp.float32).reshape(C, RR)).reshape(RR * C, 1)
    wmat = jnp.concatenate([wt, wb], axis=1).astype(compute_dtype)  # (RR*C, KP)

    # ---- patches: im2col, nearest-upsampled to the output grid, + ones row ----
    x = x_nchw.astype(jnp.float32)
    xpad = jnp.pad(x, ((0, 0), (0, 0), (1, 1), (1, 1)))
    taps = [xpad[:, :, ky:ky + H, kx:kx + W] for ky in range(3) for kx in range(3)]
    p = jnp.stack(taps, axis=1).reshape(N, K, H, W)                # (N, K, H, W)
    p = jnp.repeat(jnp.repeat(p, r, axis=2), r, axis=3)            # (N, K, Ho, Wo)
    p = p.reshape(N, K, M)
    ones = jnp.ones((N, 1, M), jnp.float32)
    patches = jnp.concatenate([p, ones], axis=1).astype(compute_dtype)  # (N, KP, M)

    # ---- parity masks: mask[ij, m] = 1 iff output pixel m has (ho%r)*r + wo%r == ij ----
    par = ((jnp.arange(Ho) % r)[:, None] * r + (jnp.arange(Wo) % r)[None, :]).reshape(1, M)
    masks = (jnp.arange(RR)[:, None] == par).astype(jnp.float32)   # (RR, M)

    g2 = gamma.astype(jnp.float32).reshape(C, 1)
    b2 = beta.astype(jnp.float32).reshape(C, 1)

    kernel = functools.partial(_fused_kernel, rr=RR, cout=C, nsteps=N,
                               count=float(N * M), eps=float(eps))

    # VMEM budget: resident output + matmul scratch + double-buffered patches + params.
    itemsize = jnp.dtype(compute_dtype).itemsize
    vmem_needed = (N * C * M * 4 + RR * C * M * 4 + 2 * KP * M * itemsize
                   + RR * C * KP * itemsize + RR * M * 4 + 4 * C * 4)
    vmem_limit = int(min(max(2 * vmem_needed, 32 * 1024 * 1024), 128 * 1024 * 1024))

    out = pl.pallas_call(
        kernel,
        out_shape=jax.ShapeDtypeStruct((N, C, M), jnp.float32),
        grid=(N,),
        in_specs=[
            pl.BlockSpec((1, KP, M), lambda n: (n, 0, 0)),      # per-batch patches
            pl.BlockSpec((RR * C, KP), lambda n: (0, 0)),       # weights (resident)
            pl.BlockSpec((RR, M), lambda n: (0, 0)),            # parity masks (resident)
            pl.BlockSpec((C, 1), lambda n: (0, 0)),             # gamma
            pl.BlockSpec((C, 1), lambda n: (0, 0)),             # beta
        ],
        # Constant index_map => whole output stays resident in VMEM across the grid,
        # so the last grid step can normalize all batches in place (single HBM writeback).
        out_specs=pl.BlockSpec((N, C, M), lambda n: (0, 0, 0)),
        scratch_shapes=[pltpu.VMEM((RR * C, M), jnp.float32),   # batched matmul result
                        pltpu.VMEM((C, 1), jnp.float32),        # BN sum
                        pltpu.VMEM((C, 1), jnp.float32)],       # BN sum of squares
        compiler_params=pltpu.CompilerParams(
            dimension_semantics=("arbitrary",),                 # stats reduction over batch
            vmem_limit_bytes=vmem_limit),
    )(patches, wmat, masks, g2, b2)

    # Free contiguous reshape (no transpose): (N, C, Ho*Wo) -> NCHW.
    return out.reshape(N, C, Ho, Wo)


# ----------------------------------------------------------------------------
# Pure-JAX reference (mirrors the PyTorch forward) for verification.
# ----------------------------------------------------------------------------
def reference(x_nchw, w_oihw, bias, gamma, beta, *, upscale=2, eps=1e-5):
    N, Cin, H, W = x_nchw.shape
    r = upscale
    Cout_total = w_oihw.shape[0]
    C = Cout_total // (r * r)
    y = lax.conv_general_dilated(
        x_nchw.astype(jnp.float32), w_oihw.astype(jnp.float32),
        window_strides=(1, 1), padding=((1, 1), (1, 1)),
        dimension_numbers=("NCHW", "OIHW", "NCHW"),
    ) + bias.reshape(1, Cout_total, 1, 1)
    z = y.reshape(N, C, r, r, H, W)
    z = jnp.transpose(z, (0, 1, 4, 2, 5, 3)).reshape(N, C, H * r, W * r)
    mean = jnp.mean(z, axis=(0, 2, 3), keepdims=True)
    var = jnp.mean((z - mean) ** 2, axis=(0, 2, 3), keepdims=True)
    zn = (z - mean) / jnp.sqrt(var + eps)
    zn = zn * gamma.reshape(1, C, 1, 1) + beta.reshape(1, C, 1, 1)
    return jnp.maximum(zn, 0.0)


if __name__ == "__main__":
    # Small shapes consistent with the module: N=2, in_ch=4, out_ch=4, upscale=2, H=W=16.
    N, in_ch, out_ch, upscale, H, W = 2, 4, 4, 2, 16, 16
    key = jax.random.PRNGKey(0)
    k1, k2, k3, k4, k5 = jax.random.split(key, 5)

    x = jax.random.normal(k1, (N, in_ch, H, W), jnp.float32)
    w = jax.random.normal(k2, (out_ch * upscale ** 2, in_ch, 3, 3), jnp.float32) * 0.1
    b = jax.random.normal(k3, (out_ch * upscale ** 2,), jnp.float32) * 0.1
    gamma = 1.0 + 0.1 * jax.random.normal(k4, (out_ch,), jnp.float32)
    beta = 0.1 * jax.random.normal(k5, (out_ch,), jnp.float32)

    ref = jax.block_until_ready(reference(x, w, b, gamma, beta, upscale=upscale))

    # fp32 matmul operands (default, tight tolerance).
    out = jax.block_until_ready(pixel_shuffle_up(x, w, b, gamma, beta, upscale=upscale))
    np.testing.assert_allclose(np.asarray(out), np.asarray(ref), rtol=2e-3, atol=2e-3)

    # bf16 matmul operands (v6e/v7x MXU path); f32 accumulation, BN re-normalizes.
    out_bf16 = jax.block_until_ready(
        pixel_shuffle_up(x, w, b, gamma, beta, upscale=upscale,
                         compute_dtype=jnp.bfloat16))
    np.testing.assert_allclose(np.asarray(out_bf16), np.asarray(ref), rtol=0.1, atol=0.1)

    print("KERNEL_OK")
</pallas_src>

<mosaic_0001>
module attributes {stable_mosaic.version = 11 : i64} {
  func.func @_fused_kernel(%arg0: i32, %arg1: memref<1x37x1024xf32, #tpu.memory_space<vmem>>, %arg2: memref<16x37xf32, #tpu.memory_space<vmem>>, %arg3: memref<4x1024xf32, #tpu.memory_space<vmem>>, %arg4: memref<4x1xf32, #tpu.memory_space<vmem>>, %arg5: memref<4x1xf32, #tpu.memory_space<vmem>>, %arg6: memref<2x4x1024xf32, #tpu.memory_space<vmem>>, %arg7: memref<16x1024xf32, #tpu.memory_space<vmem>>, %arg8: memref<4x1xf32, #tpu.memory_space<vmem>>, %arg9: memref<4x1xf32, #tpu.memory_space<vmem>>) attributes {dimension_semantics = [#tpu.dimension_semantics<arbitrary>], iteration_bounds = array<i64: 2>, scalar_prefetch = 0 : i64, scratch_operands = 3 : i64, tpu.core_type = #tpu.core_type<tc>, window_params = [{transform_indices = @transform_0, window_bounds = array<i64: 1, 37, 1024>}, {pipeline_mode = #tpu.pipeline_mode<synchronous>, transform_indices = @transform_1, window_bounds = array<i64: 16, 37>}, {pipeline_mode = #tpu.pipeline_mode<synchronous>, transform_indices = @transform_2, window_bounds = array<i64: 4, 1024>}, {pipeline_mode = #tpu.pipeline_mode<synchronous>, transform_indices = @transform_3, window_bounds = array<i64: 4, 1>}, {pipeline_mode = #tpu.pipeline_mode<synchronous>, transform_indices = @transform_4, window_bounds = array<i64: 4, 1>}, {pipeline_mode = #tpu.pipeline_mode<synchronous>, transform_indices = @transform_5, window_bounds = array<i64: 2, 4, 1024>}]} {
    %c0_i32 = arith.constant 0 : i32
    %0 = arith.cmpi eq, %arg0, %c0_i32 : i32
    %1 = arith.extui %0 : i1 to i32
    %c0_i32_0 = arith.constant 0 : i32
    %2 = arith.cmpi ne, %1, %c0_i32_0 : i32
    scf.if %2 {
      %cst_30 = arith.constant 0.000000e+00 : f32
      %45 = vector.broadcast %cst_30 : f32 to vector<4x1xf32>
      %c0_31 = arith.constant 0 : index
      %c0_32 = arith.constant 0 : index
      %46 = vector.load %arg8[%c0_31, %c0_32] : memref<4x1xf32, #tpu.memory_space<vmem>>, vector<4x1xf32>
      tpu.vector_store %arg8[%c0_31, %c0_32], %45 {strides = array<i32>} : memref<4x1xf32, #tpu.memory_space<vmem>>, vector<4x1xf32>,
      %cst_33 = arith.constant 0.000000e+00 : f32
      %47 = vector.broadcast %cst_33 : f32 to vector<4x1xf32>
      %c0_34 = arith.constant 0 : index
      %c0_35 = arith.constant 0 : index
      %48 = vector.load %arg9[%c0_34, %c0_35] : memref<4x1xf32, #tpu.memory_space<vmem>>, vector<4x1xf32>
      tpu.vector_store %arg9[%c0_34, %c0_35], %47 {strides = array<i32>} : memref<4x1xf32, #tpu.memory_space<vmem>>, vector<4x1xf32>,
    } else {
    }
    %c0 = arith.constant 0 : index
    %c0_1 = arith.constant 0 : index
    %c0_2 = arith.constant 0 : index
    %3 = vector.load %arg1[%c0, %c0_1, %c0_2] : memref<1x37x1024xf32, #tpu.memory_space<vmem>>, vector<1x37x1024xf32>
    %4 = vector.shape_cast %3 : vector<1x37x1024xf32> to vector<37x1024xf32>
    %c0_3 = arith.constant 0 : index
    %c0_4 = arith.constant 0 : index
    %5 = vector.load %arg2[%c0_3, %c0_4] : memref<16x37xf32, #tpu.memory_space<vmem>>, vector<16x37xf32>
    %cst = arith.constant dense<0.000000e+00> : vector<16x1024xf32>
    %6 = tpu.matmul %5, %4, %cst {dimension_numbers = #tpu.dot_dimension_numbers<[1], [0], [0], [1], [0, 0, 1, 1], [], []>} : vector<16x37xf32>, vector<37x1024xf32>, vector<16x1024xf32> -> vector<16x1024xf32>
    %c0_5 = arith.constant 0 : index
    %c0_6 = arith.constant 0 : index
    %7 = vector.load %arg7[%c0_5, %c0_6] : memref<16x1024xf32, #tpu.memory_space<vmem>>, vector<16x1024xf32>
    tpu.vector_store %arg7[%c0_5, %c0_6], %6 {strides = array<i32>} : memref<16x1024xf32, #tpu.memory_space<vmem>>, vector<16x1024xf32>,
    %c0_7 = arith.constant 0 : index
    %c0_8 = arith.constant 0 : index
    %8 = vector.load %arg7[%c0_7, %c0_8] : memref<16x1024xf32, #tpu.memory_space<vmem>>, vector<4x1024xf32>
    %c0_9 = arith.constant 0 : index
    %c0_10 = arith.constant 0 : index
    %9 = vector.load %arg3[%c0_9, %c0_10] : memref<4x1024xf32, #tpu.memory_space<vmem>>, vector<1x1024xf32>
    %10 = vector.broadcast %9 : vector<1x1024xf32> to vector<4x1024xf32>
    %11 = arith.mulf %8, %10 : vector<4x1024xf32>
    %c4 = arith.constant 4 : index
    %c0_11 = arith.constant 0 : index
    %12 = vector.load %arg7[%c4, %c0_11] : memref<16x1024xf32, #tpu.memory_space<vmem>>, vector<4x1024xf32>
    %c1 = arith.constant 1 : index
    %c0_12 = arith.constant 0 : index
    %13 = vector.load %arg3[%c1, %c0_12] : memref<4x1024xf32, #tpu.memory_space<vmem>>, vector<1x1024xf32>
    %14 = vector.broadcast %13 : vector<1x1024xf32> to vector<4x1024xf32>
    %15 = arith.mulf %12, %14 : vector<4x1024xf32>
    %16 = arith.addf %11, %15 : vector<4x1024xf32>
    %c8 = arith.constant 8 : index
    %c0_13 = arith.constant 0 : index
    %17 = vector.load %arg7[%c8, %c0_13] : memref<16x1024xf32, #tpu.memory_space<vmem>>, vector<4x1024xf32>
    %c2 = arith.constant 2 : index
    %c0_14 = arith.constant 0 : index
    %18 = vector.load %arg3[%c2, %c0_14] : memref<4x1024xf32, #tpu.memory_space<vmem>>, vector<1x1024xf32>
    %19 = vector.broadcast %18 : vector<1x1024xf32> to vector<4x1024xf32>
    %20 = arith.mulf %17, %19 : vector<4x1024xf32>
    %21 = arith.addf %16, %20 : vector<4x1024xf32>
    %c12 = arith.constant 12 : index
    %c0_15 = arith.constant 0 : index
    %22 = vector.load %arg7[%c12, %c0_15] : memref<16x1024xf32, #tpu.memory_space<vmem>>, vector<4x1024xf32>
    %c3 = arith.constant 3 : index
    %c0_16 = arith.constant 0 : index
    %23 = vector.load %arg3[%c3, %c0_16] : memref<4x1024xf32, #tpu.memory_space<vmem>>, vector<1x1024xf32>
    %24 = vector.broadcast %23 : vector<1x1024xf32> to vector<4x1024xf32>
    %25 = arith.mulf %22, %24 : vector<4x1024xf32>
    %26 = arith.addf %21, %25 : vector<4x1024xf32>
    %27 = arith.index_cast %arg0 : i32 to index
    %c0_17 = arith.constant 0 : index
    %c0_18 = arith.constant 0 : index
    %28 = vector.load %arg6[%27, %c0_17, %c0_18] : memref<2x4x1024xf32, #tpu.memory_space<vmem>>, vector<1x4x1024xf32>
    %29 = vector.shape_cast %28 : vector<1x4x1024xf32> to vector<4x1024xf32>
    %30 = vector.shape_cast %26 : vector<4x1024xf32> to vector<1x4x1024xf32>
    tpu.vector_store %arg6[%27, %c0_17, %c0_18], %30 {strides = array<i32>} : memref<2x4x1024xf32, #tpu.memory_space<vmem>>, vector<1x4x1024xf32>,
    %c0_19 = arith.constant 0 : index
    %c0_20 = arith.constant 0 : index
    %31 = vector.load %arg8[%c0_19, %c0_20] : memref<4x1xf32, #tpu.memory_space<vmem>>, vector<4x1xf32>
    %cst_21 = arith.constant dense<0.000000e+00> : vector<4xf32>
    %32 = vector.multi_reduction <add>, %26, %cst_21 [1] : vector<4x1024xf32> to vector<4xf32>
    %33 = vector.shape_cast %32 : vector<4xf32> to vector<4x1xf32>
    %34 = arith.addf %31, %33 : vector<4x1xf32>
    %c0_22 = arith.constant 0 : index
    %c0_23 = arith.constant 0 : index
    %35 = vector.load %arg8[%c0_22, %c0_23] : memref<4x1xf32, #tpu.memory_space<vmem>>, vector<4x1xf32>
    tpu.vector_store %arg8[%c0_22, %c0_23], %34 {strides = array<i32>} : memref<4x1xf32, #tpu.memory_space<vmem>>, vector<4x1xf32>,
    %c0_24 = arith.constant 0 : index
    %c0_25 = arith.constant 0 : index
    %36 = vector.load %arg9[%c0_24, %c0_25] : memref<4x1xf32, #tpu.memory_space<vmem>>, vector<4x1xf32>
    %37 = arith.mulf %26, %26 : vector<4x1024xf32>
    %cst_26 = arith.constant dense<0.000000e+00> : vector<4xf32>
    %38 = vector.multi_reduction <add>, %37, %cst_26 [1] : vector<4x1024xf32> to vector<4xf32>
    %39 = vector.shape_cast %38 : vector<4xf32> to vector<4x1xf32>
    %40 = arith.addf %36, %39 : vector<4x1xf32>
    %c0_27 = arith.constant 0 : index
    %c0_28 = arith.constant 0 : index
    %41 = vector.load %arg9[%c0_27, %c0_28] : memref<4x1xf32, #tpu.memory_space<vmem>>, vector<4x1xf32>
    tpu.vector_store %arg9[%c0_27, %c0_28], %40 {strides = array<i32>} : memref<4x1xf32, #tpu.memory_space<vmem>>, vector<4x1xf32>,
    %c1_i32 = arith.constant 1 : i32
    %42 = arith.cmpi eq, %arg0, %c1_i32 : i32
    %43 = arith.extui %42 : i1 to i32
    %c0_i32_29 = arith.constant 0 : i32
    %44 = arith.cmpi ne, %43, %c0_i32_29 : i32
    scf.if %44 {
      %c0_30 = arith.constant 0 : index
      %c0_31 = arith.constant 0 : index
      %45 = vector.load %arg8[%c0_30, %c0_31] : memref<4x1xf32, #tpu.memory_space<vmem>>, vector<4x1xf32>
      %cst_32 = arith.constant 4.8828125E-4 : f32
      %46 = vector.broadcast %cst_32 : f32 to vector<4x1xf32>
      %47 = arith.mulf %45, %46 : vector<4x1xf32>
      %c0_33 = arith.constant 0 : index
      %c0_34 = arith.constant 0 : index
      %48 = vector.load %arg9[%c0_33, %c0_34] : memref<4x1xf32, #tpu.memory_space<vmem>>, vector<4x1xf32>
      %cst_35 = arith.constant 4.8828125E-4 : f32
      %49 = vector.broadcast %cst_35 : f32 to vector<4x1xf32>
      %50 = arith.mulf %48, %49 : vector<4x1xf32>
      %51 = arith.mulf %47, %47 : vector<4x1xf32>
      %52 = arith.subf %50, %51 : vector<4x1xf32>
      %cst_36 = arith.constant 0.000000e+00 : f32
      %53 = vector.broadcast %cst_36 : f32 to vector<4x1xf32>
      %54 = arith.maximumf %52, %53 : vector<4x1xf32>
      %c0_37 = arith.constant 0 : index
      %c0_38 = arith.constant 0 : index
      %55 = vector.load %arg4[%c0_37, %c0_38] : memref<4x1xf32, #tpu.memory_space<vmem>>, vector<4x1xf32>
      %cst_39 = arith.constant 9.99999974E-6 : f32
      %56 = vector.broadcast %cst_39 : f32 to vector<4x1xf32>
      %57 = arith.addf %54, %56 : vector<4x1xf32>
      %58 = math.rsqrt %57 : vector<4x1xf32>
      %59 = arith.mulf %55, %58 : vector<4x1xf32>
      %c0_40 = arith.constant 0 : index
      %c0_41 = arith.constant 0 : index
      %60 = vector.load %arg5[%c0_40, %c0_41] : memref<4x1xf32, #tpu.memory_space<vmem>>, vector<4x1xf32>
      %61 = arith.mulf %47, %59 : vector<4x1xf32>
      %62 = arith.subf %60, %61 : vector<4x1xf32>
      %c0_42 = arith.constant 0 : index
      %c0_43 = arith.constant 0 : index
      %c0_44 = arith.constant 0 : index
      %63 = vector.load %arg6[%c0_42, %c0_43, %c0_44] : memref<2x4x1024xf32, #tpu.memory_space<vmem>>, vector<2x4x1024xf32>
      %64 = vector.shape_cast %59 : vector<4x1xf32> to vector<1x4x1xf32>
      %65 = vector.broadcast %64 : vector<1x4x1xf32> to vector<2x4x1024xf32>
      %66 = arith.mulf %63, %65 : vector<2x4x1024xf32>
      %67 = vector.shape_cast %62 : vector<4x1xf32> to vector<1x4x1xf32>
      %68 = vector.broadcast %67 : vector<1x4x1xf32> to vector<2x4x1024xf32>
      %69 = arith.addf %66, %68 : vector<2x4x1024xf32>
      %cst_45 = arith.constant 0.000000e+00 : f32
      %70 = vector.broadcast %cst_45 : f32 to vector<2x4x1024xf32>
      %71 = arith.maximumf %69, %70 : vector<2x4x1024xf32>
      %c0_46 = arith.constant 0 : index
      %c0_47 = arith.constant 0 : index
      %c0_48 = arith.constant 0 : index
      %72 = vector.load %arg6[%c0_46, %c0_47, %c0_48] : memref<2x4x1024xf32, #tpu.memory_space<vmem>>, vector<2x4x1024xf32>
      tpu.vector_store %arg6[%c0_46, %c0_47, %c0_48], %71 {strides = array<i32>} : memref<2x4x1024xf32, #tpu.memory_space<vmem>>, vector<2x4x1024xf32>,
    } else {
    }
    return
  }
  func.func @transform_0(%arg0: i32) -> (i32, i32, i32) {
    %c0_i32 = arith.constant 0 : i32
    %c0_i32_0 = arith.constant 0 : i32
    %c0_i32_1 = arith.constant 0 : i32
    return %arg0, %c0_i32, %c0_i32_0 : i32, i32, i32
  }
  func.func @transform_1(%arg0: i32) -> (i32, i32) {
    %c0_i32 = arith.constant 0 : i32
    %c0_i32_0 = arith.constant 0 : i32
    %c0_i32_1 = arith.constant 0 : i32
    return %c0_i32, %c0_i32_0 : i32, i32
  }
  func.func @transform_2(%arg0: i32) -> (i32, i32) {
    %c0_i32 = arith.constant 0 : i32
    %c0_i32_0 = arith.constant 0 : i32
    %c0_i32_1 = arith.constant 0 : i32
    return %c0_i32, %c0_i32_0 : i32, i32
  }
  func.func @transform_3(%arg0: i32) -> (i32, i32) {
    %c0_i32 = arith.constant 0 : i32
    %c0_i32_0 = arith.constant 0 : i32
    %c0_i32_1 = arith.constant 0 : i32
    return %c0_i32, %c0_i32_0 : i32, i32
  }
  func.func @transform_4(%arg0: i32) -> (i32, i32) {
    %c0_i32 = arith.constant 0 : i32
    %c0_i32_0 = arith.constant 0 : i32
    %c0_i32_1 = arith.constant 0 : i32
    return %c0_i32, %c0_i32_0 : i32, i32
  }
  func.func @transform_5(%arg0: i32) -> (i32, i32, i32) {
    %c0_i32 = arith.constant 0 : i32
    %c0_i32_0 = arith.constant 0 : i32
    %c0_i32_1 = arith.constant 0 : i32
    %c0_i32_2 = arith.constant 0 : i32
    return %c0_i32, %c0_i32_0, %c0_i32_1 : i32, i32, i32
  }
}

</mosaic_0001>

<bundles_post_ra>
// kernel: pixel_shuffle_up.1
= control target key start
LH: loop header
LB: loop body
LE: loop exit
PB: predicated region body
PF: predicated region fallthrough
CT: control target
= control target key end

     0   :  { %s1228_s18 = smov 0   ;;  %s1586_s0 = inlined_call_operand.vmem [shape: f32[2,37,1024], index: 0, kind: input, shape index: {}]   ;;  %s1587_s1 = inlined_call_operand.vmem [shape: f32[16,37], index: 1, kind: input, shape index: {}]   ;;  %s1588_s2 = inlined_call_operand.vmem [shape: f32[4,1024], index: 2, kind: input, shape index: {}]   ;;  %s1589_s3 = inlined_call_operand.vmem [shape: f32[4,1], index: 3, kind: input, shape index: {}]   ;;  %s1590_s4 = inlined_call_operand.vmem [shape: f32[4,1], index: 4, kind: input, shape index: {}]   ;;  %s1591_s5 = inlined_call_operand.vmem [shape: f32[2,4,1024], index: 5, kind: output, shape index: {}]  }
   0x1 LB: > { %s1234_s19 = sadd.s32 4294967295, %s1192_s18   ;;  %p1110_p0 = scmp.ge.s32.totalorder %s1192_s18, 1  ;;  %s1192_s18 = sphi %s1228_s18, %s15_s18  }
   0x2   : > { %p182_p1 = scmp.lt.s32.totalorder %s1192_s18, 3 }
   0x4   : > { %p183_p2 = pnand %p1110_p0, %p182_p1 }
   0x5   : > { %p205_p3 = scmp.lt.s32.totalorder (!%p183_p2), %s1234_s19, 1  ;;  %p1112_p4 = scmp.ne.s32.totalorder (!%p183_p2), %s1234_s19, 0 }
   0x6   : > { %186 = sbr.rel (%p183_p2) target bundleno = 610 (0x262), region = 40 }
   0xd   : > { %s206_s20 = scalar_select %p205_p3, %s1234_s19, 1 }
   0xe   : > { %213 = sbr.rel (%p1112_p4) target bundleno = 21 (0x15), region = 44  ;;  %vm214_vm0 = vcmask (!%p1112_p4), 3072   ;;  %v1194_v0 = vmov (!%p1112_p4), 0.0  }
   0xf   : > { %s1170_s21 = smul.u32 320, %s206_s20  ;;  %215 = vst.msk [vmem:[#allocation3] sm:$0xf] (!%p1112_p4), %vm214_vm0, %v1194_v0  ;;  %216 = vst.msk [vmem:[#allocation4] sm:$0xf] (!%p1112_p4), %vm214_vm0, %v1194_v0 }
  0x11   : > { %s1243_s24 = scalar_lea.vmem %s1586_s0, %s1170_s21 }
  0x15 PF: > { %v218_v1 = vld [vmem:[%s1243_s24 + $0x8] sm:$0xff]  ;;  %v217_v3 = vld [vmem:[%s1243_s24] sm:$0xff]  ;;  %v220_v6 = vld [vmem:[%s1243_s24 + $0x18] sm:$0xff]  ;;  %v1195_v8 = vmov 0.0   ;;  %vm266_vm1 = vcmask 1044480   ;;  %vm259_vm2 = vcmask 302080   ;;  %v625_v60 = vlaneseq }
  0x16   : > { %v226_v2 = vld [vmem:[%s1243_s24 + $0x48] sm:$0xff]  ;;  %v225_v5 = vld [vmem:[%s1243_s24 + $0x40] sm:$0xff]  ;;  %v228_v7 = vld [vmem:[%s1243_s24 + $0x58] sm:$0xff]  ;;  %355 = vmatprep.mubr.f32.mxu0 %v1195_v8  ;;  %432 = vmatprep.mubr.f32.mxu1 %v1195_v8  ;;  %s1137_s12 = sshll.u32 %s1234_s19, 5  ;;  %vm946_vm3 = vcmask 1043456   ;;  %vm965_vm4 = vcmask 3072  }
  0x17   : > { %v1138_v4 = vpack.c.bf16 %v226_v2, %v218_v1  ;;  %v1140_v9 = vpack.c.bf16 %v225_v5, %v217_v3  ;;  %v1146_v10 = vpack.c.bf16 %v228_v7, %v220_v6  ;;  %v219_v11 = vld [vmem:[%s1243_s24 + $0x10] sm:$0xff]  ;;  %v234_v13 = vld [vmem:[%s1243_s24 + $0x88] sm:$0xff]  ;;  %v233_v16 = vld [vmem:[%s1243_s24 + $0x80] sm:$0xff]  ;;  %v1316_v61 = vshrl.u32 %v625_v60, 7  ;;  %s1467_s15 = scalar_lea.vmem %s1591_s5, %s1137_s12  ;;  %p1134_p5 = scmp.ne.s32.totalorder %s1234_s19, 1 }
  0x18   : > { %v227_v12 = vld [vmem:[%s1243_s24 + $0x50] sm:$0xff]  ;;  %v242_v15 = vld [vmem:[%s1243_s24 + $0xc8] sm:$0xff]  ;;  %v241_v17 = vld [vmem:[%s1243_s24 + $0xc0] sm:$0xff] }
  0x19   : > { %1139 = vmatprep.subr.bf16.mxu0 %v1138_v4  ;;  %v1148_v14 = vpack.c.bf16 %v227_v12, %v219_v11  ;;  %1147 = vmatprep.subr.bf16.mxu1 %v1146_v10  ;;  %v1142_v18 = vpack.c.bf16 %v242_v15, %v234_v13  ;;  %v1144_v19 = vpack.c.bf16 %v241_v17, %v233_v16  ;;  %v236_v20 = vld [vmem:[%s1243_s24 + $0x98] sm:$0xff]  ;;  %v235_v22 = vld [vmem:[%s1243_s24 + $0x90] sm:$0xff]  ;;  %v250_v26 = vld [vmem:[%s1243_s24 + $0x108] sm:$0x1f]  ;;  %v1319_v62 = vsub.s32 0, %v1316_v61 }
  0x1a   : > { %1141 = vmatpush1.bf16.msra.mxu0 %v1140_v9  ;;  %v244_v21 = vld [vmem:[%s1243_s24 + $0xd8] sm:$0xff]  ;;  %v243_v24 = vld [vmem:[%s1243_s24 + $0xd0] sm:$0xff]  ;;  %v222_v27 = vld [vmem:[%s1243_s24 + $0x28] sm:$0xff]  ;;  %v1322_v63 = vsub.s32 1, %v1316_v61  ;;  %v1330_v1 = vsub.s32 2, %v1316_v61  ;;  %v1333_v2 = vsub.s32 3, %v1316_v61 }
  0x1b   : > { %1149 = vmatpush1.bf16.msra.mxu1 %v1148_v14  ;;  %v1150_v23 = vpack.c.bf16 %v244_v21, %v236_v20  ;;  %1143 = vmatprep.subr.bf16.mxu0 %v1142_v18  ;;  %v1152_v25 = vpack.c.bf16 %v243_v24, %v235_v22  ;;  %v252_v28 = vld [vmem:[%s1243_s24 + $0x118] sm:$0x1f]  ;;  %v230_v29 = vld [vmem:[%s1243_s24 + $0x68] sm:$0xff]  ;;  %v221_v30 = vld [vmem:[%s1243_s24 + $0x20] sm:$0xff]  ;;  %v1359_v14 = vsub.s32 4, %v1316_v61  ;;  %v1362_v15 = vsub.s32 5, %v1316_v61 }
  0x1c   : > { %v229_v31 = vld [vmem:[%s1243_s24 + $0x60] sm:$0xff]  ;;  %v224_v32 = vld [vmem:[%s1243_s24 + $0x38] sm:$0xff]  ;;  %v1154_v35 = vpack.c.bf16 %v230_v29, %v222_v27  ;;  %v223_v36 = vld [vmem:[%s1243_s24 + $0x30] sm:$0xff]  ;;  %v1372_v20 = vsub.s32 7, %v1316_v61 }
  0x1d   : > { %1151 = vmatprep.subr.bf16.mxu1 %v1150_v23  ;;  %v232_v33 = vld [vmem:[%s1243_s24 + $0x78] sm:$0xff]  ;;  %v249_v34 = vld [vmem:[%s1243_s24 + $0x100] sm:$0x1f]  ;;  %v231_v37 = vld [vmem:[%s1243_s24 + $0x70] sm:$0xff]  ;;  %v1156_v39 = vpack.c.bf16 %v229_v31, %v221_v30 }
  0x1e   : > { %1145 = vmatpush1.bf16.msra.mxu0 %v1144_v19  ;;  %v257_v38 = vld [vmem:[%s1587_s1] sm:$0xff]  ;;  %v238_v40 = vld [vmem:[%s1243_s24 + $0xa8] sm:$0xff]  ;;  %v251_v42 = vld [vmem:[%s1243_s24 + $0x110] sm:$0x1f]  ;;  %v1162_v43 = vpack.c.bf16 %v232_v33, %v224_v32  ;;  %v1164_v46 = vpack.c.bf16 %v231_v37, %v223_v36  ;;  %v1369_v19 = vsub.s32 6, %v1316_v61 }
  0x1f   : > { %1153 = vmatpush1.bf16.msra.mxu1 %v1152_v25  ;;  %1113 = vmatprep.subr.msk.mxu0 %vm266_vm1, %v250_v26  ;;  %v246_v41 = vld [vmem:[%s1243_s24 + $0xe8] sm:$0xff]  ;;  %v237_v44 = vld [vmem:[%s1243_s24 + $0xa0] sm:$0xff]  ;;  %v240_v47 = vld [vmem:[%s1243_s24 + $0xb8] sm:$0xff] }
  0x20   : > { %1117 = vmatprep.subr.msk.mxu1 %vm266_vm1, %v252_v28  ;;  %v245_v45 = vld [vmem:[%s1243_s24 + $0xe0] sm:$0xff]  ;;  %v248_v48 = vld [vmem:[%s1243_s24 + $0xf8] sm:$0xff]  ;;  %v1158_v49 = vpack.c.bf16 %v246_v41, %v238_v40  ;;  %v239_v50 = vld [vmem:[%s1243_s24 + $0xb0] sm:$0xff] }
  0x21   : > { %v247_v51 = vld [vmem:[%s1243_s24 + $0xf0] sm:$0xff]  ;;  %v258_v52 = vld [vmem:[%s1587_s1 + $0x8] sm:$0xff]  ;;  %v1160_v53 = vpack.c.bf16 %v245_v45, %v237_v44  ;;  %v1166_v54 = vpack.c.bf16 %v248_v48, %v240_v47  ;;  %v256_v57 = vld [vmem:[%s1243_s24 + $0x138] sm:$0x1f] }
  0x22   : > { %1114 = vmatpush1.msk.msra.mxu0 %vm266_vm1, %v249_v34  ;;  %v1168_v55 = vpack.c.bf16 %v247_v51, %v239_v50  ;;  %v254_v56 = vld [vmem:[%s1243_s24 + $0x128] sm:$0x1f]  ;;  %v253_v58 = vld [vmem:[%s1243_s24 + $0x120] sm:$0x1f]  ;;  %v255_v59 = vld [vmem:[%s1243_s24 + $0x130] sm:$0x1f] }
  0x23   : > { %1115 = vmatmul.mubr.msk.f32.vlgmr.msra.gmra.mrb[0].mxu0 %vm259_vm2, %v257_v38  ;;  %1155 = vmatprep.subr.bf16.mxu0 %v1154_v35  ;;  %v1327_v0 = vld [vmem:[%s1588_s2] ss:$4 sm:$0xff]  ;;  %v1338_v3 = vld [vmem:[%s1588_s2 + $0x1] ss:$4 sm:$0xff]  ;;  %v1343_v6 = vld [vmem:[%s1588_s2 + $0x2] ss:$4 sm:$0xff] }
  0x24   : > { %1118 = vmatpush1.msk.msra.mxu1 %vm266_vm1, %v251_v42  ;;  %1157 = vmatpush1.bf16.msra.mxu0 %v1156_v39  ;;  %v1348_v7 = vld [vmem:[%s1588_s2 + $0x3] ss:$4 sm:$0xff]  ;;  %v628_v9 = vrot.slane %v1327_v0, %v1319_v62  ;;  %v632_v10 = vrot.slane %v1327_v0, %v1322_v63  ;;  %v687_v11 = vrot.slane %v1338_v3, %v1319_v62 }
  0x25   : > { %1119 = vmatmul.mubr.msk.f32.vlgmr.msra.gmra.mrb[0].mxu1 %vm259_vm2, %v257_v38  ;;  %1163 = vmatprep.subr.bf16.mxu1 %v1162_v43  ;;  %v691_v12 = vrot.slane %v1338_v3, %v1322_v63  ;;  %v695_v16 = vrot.slane %v1338_v3, %v1330_v1  ;;  %v699_v17 = vrot.slane %v1338_v3, %v1333_v2 }
  0x26   : > { %361 = vmatprep.mubr.f32.mxu0 %v1195_v8  ;;  %1165 = vmatpush1.bf16.msra.mxu1 %v1164_v46  ;;  %v778_v21 = vrot.slane %v1343_v6, %v1319_v62  ;;  %v845_v22 = vrot.slane %v1348_v7, %v1319_v62  ;;  %v636_v24 = vrot.slane %v1327_v0, %v1330_v1 }
  0x27   : > { %1116 = vmatmul.mubr.msk.f32.gmra.mrb[2].mxu0 %vm259_vm2, %v258_v52  ;;  %1159 = vmatprep.subr.bf16.mxu0 %v1158_v49  ;;  %v640_v25 = vrot.slane %v1327_v0, %v1333_v2  ;;  %v782_v26 = vrot.slane %v1343_v6, %v1322_v63  ;;  %v849_v27 = vrot.slane %v1348_v7, %v1322_v63 }
  0x28   : > { %438 = vmatprep.mubr.f32.mxu1 %v1195_v8  ;;  %1161 = vmatpush1.bf16.msra.mxu0 %v1160_v53  ;;  %v786_v29 = vrot.slane %v1343_v6, %v1330_v1  ;;  %v790_v30 = vrot.slane %v1343_v6, %v1333_v2  ;;  %v853_v31 = vrot.slane %v1348_v7, %v1330_v1 }
  0x29   : > { %1120 = vmatmul.mubr.msk.f32.gmra.mrb[2].mxu1 %vm259_vm2, %v258_v52  ;;  %1167 = vmatprep.subr.bf16.mxu1 %v1166_v54  ;;  %v857_v32 = vrot.slane %v1348_v7, %v1333_v2  ;;  %v644_v34 = vrot.slane %v1327_v0, %v1359_v14  ;;  %v648_v35 = vrot.slane %v1327_v0, %v1362_v15 }
  0x2a   : > { %1169 = vmatpush1.bf16.msra.mxu1 %v1168_v55  ;;  %1121 = vmatprep.subr.msk.mxu0 %vm266_vm1, %v254_v56  ;;  %v703_v36 = vrot.slane %v1338_v3, %v1359_v14  ;;  %v707_v37 = vrot.slane %v1338_v3, %v1362_v15  ;;  %v652_v39 = vrot.slane %v1327_v0, %v1369_v19 }
  0x2b   : > { %509 = vmatprep.mubr.f32.mxu0 %v1195_v8  ;;  %1125 = vmatprep.subr.msk.mxu1 %vm266_vm1, %v256_v57  ;;  %v656_v40 = vrot.slane %v1327_v0, %v1372_v20  ;;  %v711_v42 = vrot.slane %v1338_v3, %v1369_v19  ;;  %v715_v43 = vrot.slane %v1338_v3, %v1372_v20 }
  0x2c   : > { %1122 = vmatpush1.msk.msra.mxu0 %vm266_vm1, %v253_v58  ;;  %586 = vmatprep.mubr.f32.mxu1 %v1195_v8  ;;  %v794_v48 = vrot.slane %v1343_v6, %v1359_v14  ;;  %v861_v49 = vrot.slane %v1348_v7, %v1359_v14  ;;  %v798_v54 = vrot.slane %v1343_v6, %v1362_v15 }
  0x2d   : > { %1123 = vmatmul.mubr.msk.f32.vlgmr.msra.gmra.mrb[4].mxu0 %vm259_vm2, %v257_v38  ;;  %v802_v55 = vrot.slane %v1343_v6, %v1369_v19  ;;  %v865_v56 = vrot.slane %v1348_v7, %v1362_v15 }
  0x2e   : > { %1126 = vmatpush1.msk.msra.mxu1 %vm266_vm1, %v255_v59  ;;  %515 = vmatprep.mubr.f32.mxu0 %v1195_v8 }
  0x2f   : > { %1127 = vmatmul.mubr.msk.f32.vlgmr.msra.gmra.mrb[4].mxu1 %vm259_vm2, %v257_v38 }
  0x30   : > { %592 = vmatprep.mubr.f32.mxu1 %v1195_v8 }
  0x31   : > { %1124 = vmatmul.mubr.msk.f32.gmra.mrb[6].mxu0 %vm259_vm2, %v258_v52 }
  0x33   : > { %1128 = vmatmul.mubr.msk.f32.gmra.mrb[6].mxu1 %vm259_vm2, %v258_v52 }
  0xf6   : > { %v357_v4 = vpop.f32.mrb[0].mxu0 }
  0xf7   : > { %599 = vst [vmem:[#allocation2] sm:$0xff] %v357_v4  ;;  %v359_v5 = vpop.f32.mrb[1].mxu0 }
  0xf8   : > { %600 = vst [vmem:[#allocation2 + $0x8] sm:$0xff] %v359_v5  ;;  %v434_v8 = vpop.f32.mrb[0].mxu1  ;;  %v806_v5 = vrot.slane %v1343_v6, %v1372_v20 }
  0xf9   : > { %601 = vst [vmem:[#allocation2 + $0x10] sm:$0xff] %v434_v8  ;;  %v436_v13 = vpop.f32.mrb[1].mxu1 }
  0xfa   : > { %602 = vst [vmem:[#allocation2 + $0x18] sm:$0xff] %v436_v13  ;;  %v363_v18 = vpop.f32.mrb[2].mxu0 }
  0xfb   : > { %607 = vst [vmem:[#allocation2 + $0x40] sm:$0xff] %v363_v18  ;;  %v365_v23 = vpop.f32.mrb[3].mxu0 }
  0xfc   : > { %608 = vst [vmem:[#allocation2 + $0x48] sm:$0xff] %v365_v23  ;;  %v440_v28 = vpop.f32.mrb[2].mxu1 }
  0xfd   : > { %609 = vst [vmem:[#allocation2 + $0x50] sm:$0xff] %v440_v28  ;;  %v442_v33 = vpop.f32.mrb[3].mxu1 }
  0xfe   : > { %610 = vst [vmem:[#allocation2 + $0x58] sm:$0xff] %v442_v33  ;;  %v615_v38 = vld [vmem:[#allocation2] sm:$0xf]  ;;  %v673_v41 = vld [vmem:[#allocation2] sm:$0xf0] }
  0xff   : > { %v616_v44 = vld [vmem:[#allocation2 + $0x8] sm:$0xf]  ;;  %v665_v45 = vmul.f32 %v628_v9, %v615_v38  ;;  %v674_v46 = vld [vmem:[#allocation2 + $0x8] sm:$0xf0]  ;;  %v724_v47 = vmul.f32 %v687_v11, %v673_v41 }
 0x100   : > { %v511_v50 = vpop.f32.mrb[4].mxu0  ;;  %v617_v51 = vld [vmem:[#allocation2 + $0x10] sm:$0xf]  ;;  %v675_v52 = vld [vmem:[#allocation2 + $0x10] sm:$0xf0]  ;;  %v725_v53 = vmul.f32 %v691_v12, %v674_v46  ;;  %v666_v9 = vmul.f32 %v632_v10, %v616_v44 }
 0x101   : > { %603 = vst [vmem:[#allocation2 + $0x20] sm:$0xff] %v511_v50  ;;  %v513_v57 = vpop.f32.mrb[5].mxu0  ;;  %v618_v58 = vld [vmem:[#allocation2 + $0x18] sm:$0xf]  ;;  %v667_v59 = vmul.f32 %v636_v24, %v617_v51  ;;  %v676_v60 = vld [vmem:[#allocation2 + $0x18] sm:$0xf0]  ;;  %v726_v62 = vmul.f32 %v695_v16, %v675_v52 }
 0x102   : > { %v740_v4 = vrot.slane %v724_v47, 4  ;;  %604 = vst [vmem:[#allocation2 + $0x28] sm:$0xff] %v513_v57  ;;  %v588_v8 = vpop.f32.mrb[4].mxu1  ;;  %v668_v11 = vmul.f32 %v640_v25, %v618_v58  ;;  %v727_v12 = vmul.f32 %v699_v17, %v676_v60  ;;  %v741_v13 = vrot.slane %v725_v53, 4  ;;  %v764_v18 = vld [vmem:[#allocation2 + $0x40] sm:$0xf] }
 0x103   : > { %v831_v23 = vld [vmem:[#allocation2 + $0x40] sm:$0xf0]  ;;  %605 = vst [vmem:[#allocation2 + $0x30] sm:$0xff] %v588_v8  ;;  %v590_v28 = vpop.f32.mrb[5].mxu1  ;;  %v742_v24 = vrot.slane %v726_v62, 4  ;;  %v815_v38 = vmul.f32 %v778_v21, %v764_v18 }
 0x104   : > { %v756_v33 = vadd.f32 %v740_v4, %v665_v45  ;;  %v765_v16 = vld [vmem:[#allocation2 + $0x48] sm:$0xf]  ;;  %v832_v41 = vld [vmem:[#allocation2 + $0x48] sm:$0xf0]  ;;  %v882_v46 = vmul.f32 %v845_v22, %v831_v23  ;;  %606 = vst [vmem:[#allocation2 + $0x38] sm:$0xff] %v590_v28  ;;  %v517_v47 = vpop.f32.mrb[6].mxu0  ;;  %v757_v51 = vadd.f32 %v741_v13, %v666_v9 }
 0x105   : > { %v743_v50 = vrot.slane %v727_v12, 4  ;;  %v766_v52 = vld [vmem:[#allocation2 + $0x50] sm:$0xf]  ;;  %v816_v10 = vmul.f32 %v782_v26, %v765_v16  ;;  %v833_v17 = vld [vmem:[#allocation2 + $0x50] sm:$0xf0]  ;;  %v883_v25 = vmul.f32 %v849_v27, %v832_v41  ;;  %611 = vst [vmem:[#allocation2 + $0x60] sm:$0xff] %v517_v47  ;;  %v758_v45 = vadd.f32 %v742_v24, %v667_v59 }
 0x106   : > { %v519_v44 = vpop.f32.mrb[7].mxu0  ;;  %v767_v21 = vld [vmem:[#allocation2 + $0x58] sm:$0xf]  ;;  %v817_v22 = vmul.f32 %v786_v29, %v766_v52  ;;  %v823_v53 = vadd.f32 %v815_v38, %v756_v33  ;;  %v834_v57 = vld [vmem:[#allocation2 + $0x58] sm:$0xf0]  ;;  %v884_v26 = vmul.f32 %v853_v31, %v833_v17  ;;  %v594_v58 = vpop.f32.mrb[6].mxu1  ;;  %v873_v12 = vrot.slane %v1348_v7, %v1372_v20 }
 0x107   : > { %612 = vst [vmem:[#allocation2 + $0x68] sm:$0xff] %v519_v44  ;;  %v759_v60 = vadd.f32 %v743_v50, %v668_v11  ;;  %v818_v63 = vmul.f32 %v790_v30, %v767_v21  ;;  %v824_v27 = vadd.f32 %v816_v10, %v757_v51  ;;  %v885_v59 = vmul.f32 %v857_v32, %v834_v57  ;;  %v596_v29 = vpop.f32.mrb[7].mxu1 }
 0x108   : > { %613 = vst [vmem:[#allocation2 + $0x70] sm:$0xff] %v594_v58  ;;  %v825_v62 = vadd.f32 %v817_v22, %v758_v45  ;;  %v898_v4 = vrot.slane %v882_v46, 4  ;;  %v899_v8 = vrot.slane %v883_v25, 4  ;;  %v900_v9 = vrot.slane %v884_v26, 4  ;;  %614 = vst [vmem:[#allocation2 + $0x78] sm:$0xff] %v596_v29 }
 0x109   : > { %v619_v1 = vld [vmem:[#allocation2 + $0x20] sm:$0xf]  ;;  %v677_v31 = vld [vmem:[#allocation2 + $0x20] sm:$0xf0]  ;;  %v826_v11 = vadd.f32 %v818_v63, %v759_v60  ;;  %v869_v30 = vrot.slane %v1348_v7, %v1369_v19  ;;  %v901_v2 = vrot.slane %v885_v59, 4 }
 0x10a   : > { %v620_v32 = vld [vmem:[#allocation2 + $0x28] sm:$0xf]  ;;  %v669_v13 = vmul.f32 %v644_v34, %v619_v1  ;;  %v678_v18 = vld [vmem:[#allocation2 + $0x28] sm:$0xf0]  ;;  %v728_v23 = vmul.f32 %v703_v36, %v677_v31  ;;  %v914_v28 = vadd.f32 %v898_v4, %v823_v53  ;;  %v1454_v24 = vadd.f32 %v899_v8, %v824_v27  ;;  %v621_v33 = vld [vmem:[#allocation2 + $0x30] sm:$0xf] }
 0x10b   : > { %v670_v16 = vmul.f32 %v648_v35, %v620_v32  ;;  %v679_v38 = vld [vmem:[#allocation2 + $0x30] sm:$0xf0]  ;;  %v729_v41 = vmul.f32 %v707_v37, %v678_v18  ;;  %v916_v46 = vadd.f32 %v900_v9, %v825_v62  ;;  %v1462_v34 = vadd.f32 %v901_v2, %v826_v11  ;;  %v622_v36 = vld [vmem:[#allocation2 + $0x38] sm:$0xf]  ;;  %v680_v50 = vld [vmem:[#allocation2 + $0x38] sm:$0xf0] }
 0x10c   : > { %v671_v47 = vmul.f32 %v652_v39, %v621_v33  ;;  %v730_v35 = vmul.f32 %v711_v42, %v679_v38  ;;  %v744_v37 = vrot.slane %v728_v23, 4  ;;  %v930_v51 = vcombine.low %v914_v28, %v1454_v24  ;;  %v768_v25 = vld [vmem:[#allocation2 + $0x60] sm:$0xf]  ;;  %v835_v39 = vld [vmem:[#allocation2 + $0x60] sm:$0xf0] }
 0x10d   : > { %v672_v52 = vmul.f32 %v656_v40, %v622_v36  ;;  %v731_v10 = vmul.f32 %v715_v43, %v680_v50  ;;  %v745_v17 = vrot.slane %v729_v41, 4  ;;  %v931_v44 = vcombine.low %v916_v46, %v1462_v34 }
 0x10e   : > { %v746_v45 = vrot.slane %v730_v35, 4  ;;  %v760_v21 = vadd.f32 %v744_v37, %v669_v13  ;;  %v769_v42 = vld [vmem:[#allocation2 + $0x68] sm:$0xf]  ;;  %v819_v22 = vmul.f32 %v794_v48, %v768_v25  ;;  %v836_v53 = vld [vmem:[#allocation2 + $0x68] sm:$0xf0]  ;;  %v886_v0 = vmul.f32 %v861_v49, %v835_v39  ;;  %941 = vst [vmem:[%s1467_s15] sm:$0xff] %v930_v51 }
 0x10f   : > { %v747_v3 = vrot.slane %v731_v10, 4  ;;  %v761_v40 = vadd.f32 %v745_v17, %v670_v16  ;;  %v770_v43 = vld [vmem:[#allocation2 + $0x70] sm:$0xf]  ;;  %v820_v57 = vmul.f32 %v798_v54, %v769_v42  ;;  %v837_v26 = vld [vmem:[#allocation2 + $0x70] sm:$0xf0]  ;;  %v887_v58 = vmul.f32 %v865_v56, %v836_v53  ;;  %942 = vst [vmem:[%s1467_s15 + $0x8] sm:$0xff] %v931_v44 }
 0x110   : > { %v762_v48 = vadd.f32 %v746_v45, %v671_v47  ;;  %v771_v60 = vld [vmem:[#allocation2 + $0x78] sm:$0xf]  ;;  %v821_v14 = vmul.f32 %v802_v55, %v770_v43  ;;  %v827_v49 = vadd.f32 %v819_v22, %v760_v21  ;;  %v838_v63 = vld [vmem:[#allocation2 + $0x78] sm:$0xf0]  ;;  %v888_v27 = vmul.f32 %v869_v30, %v837_v26 }
 0x111   : > { %v763_v59 = vadd.f32 %v747_v3, %v672_v52  ;;  %v822_v54 = vmul.f32 %v806_v5, %v771_v60  ;;  %v828_v29 = vadd.f32 %v820_v57, %v761_v40  ;;  %v889_v62 = vmul.f32 %v873_v12, %v838_v63  ;;  %v945_v57 = vld [vmem:[#allocation3] sm:$0xf] }
 0x112   : > { %v829_v4 = vadd.f32 %v821_v14, %v762_v48  ;;  %v902_v7 = vrot.slane %v886_v0, 4  ;;  %v903_v15 = vrot.slane %v887_v58, 4  ;;  %v904_v56 = vrot.slane %v888_v27, 4  ;;  %v967_v48 = vld [vmem:[#allocation4] sm:$0xf] }
 0x113   : > { %v830_v8 = vadd.f32 %v822_v54, %v763_v59  ;;  %v905_v9 = vrot.slane %v889_v62, 4  ;;  %v947_v1 = vsel %vm946_vm3, %v914_v28, 0.0  ;;  %v948_v19 = vsel %vm946_vm3, %v1454_v24, 0.0 }
 0x114   : > { %v918_v55 = vadd.f32 %v902_v7, %v827_v49  ;;  %v919_v31 = vadd.f32 %v903_v15, %v828_v29  ;;  %v920_v11 = vadd.f32 %v904_v56, %v829_v4  ;;  %v949_v6 = vadd.f32 %v948_v19, %v947_v1  ;;  %v1006_v15 = vld [vmem:[%s1589_s3] sm:$0xf] (!%p1134_p5) }
 0x115   : > { %v921_v20 = vadd.f32 %v905_v9, %v830_v8  ;;  %v950_v5 = vsel %vm946_vm3, %v916_v46, 0.0  ;;  %v968_v30 = vmul.f32 %v914_v28, %v914_v28  ;;  %v952_v2 = vsel %vm946_vm3, %v1462_v34, 0.0  ;;  %v1010_v9 = vld [vmem:[%s1590_s4] sm:$0xf] (!%p1134_p5) }
 0x116   : > { %v951_v12 = vadd.f32 %v950_v5, %v949_v6  ;;  %v954_v13 = vsel %vm946_vm3, %v918_v55, 0.0  ;;  %v932_v18 = vcombine.low %v918_v55, %v919_v31  ;;  %v969_v23 = vmul.f32 %v1454_v24, %v1454_v24 }
 0x117   : > { %v933_v32 = vcombine.low %v920_v11, %v921_v20  ;;  %v970_v16 = vmul.f32 %v916_v46, %v916_v46  ;;  %v956_v38 = vsel %vm946_vm3, %v919_v31, 0.0  ;;  %v971_v28 = vmul.f32 %v1462_v34, %v1462_v34 }
 0x118   : > { %v953_v33 = vadd.f32 %v952_v2, %v951_v12  ;;  %943 = vst [vmem:[%s1467_s15 + $0x10] sm:$0xff] %v932_v18  ;;  %v976_v41 = vsel %vm946_vm3, %v968_v30, 0.0  ;;  %v972_v47 = vmul.f32 %v918_v55, %v918_v55  ;;  %v977_v50 = vsel %vm946_vm3, %v969_v23, 0.0 }
 0x119   : > { %944 = vst [vmem:[%s1467_s15 + $0x18] sm:$0xff] %v933_v32  ;;  %v979_v35 = vsel %vm946_vm3, %v970_v16, 0.0  ;;  %v978_v37 = vadd.f32 %v977_v50, %v976_v41  ;;  %v973_v24 = vmul.f32 %v919_v31, %v919_v31  ;;  %v958_v46 = vsel %vm946_vm3, %v920_v11, 0.0 }
 0x11a   : > { %v955_v36 = vadd.f32 %v954_v13, %v953_v33  ;;  %v981_v17 = vsel %vm946_vm3, %v971_v28, 0.0  ;;  %v983_v25 = vsel %vm946_vm3, %v972_v47, 0.0  ;;  %v960_v34 = vsel %vm946_vm3, %v921_v20, 0.0 }
 0x11b   : > { %v980_v52 = vadd.f32 %v979_v35, %v978_v37  ;;  %v974_v45 = vmul.f32 %v920_v11, %v920_v11  ;;  %v985_v21 = vsel %vm946_vm3, %v973_v24, 0.0  ;;  %v975_v22 = vmul.f32 %v921_v20, %v921_v20 }
 0x11c   : > { %v957_v51 = vadd.f32 %v956_v38, %v955_v36  ;;  %v1196_v27 = vmov (!%p1134_p5), 0   ;;  %v1197_v55 = vmov (!%p1134_p5), 839922192  }
 0x11d   : > { %v982_v39 = vadd.f32 %v981_v17, %v980_v52  ;;  %v987_v0 = vsel %vm946_vm3, %v974_v45, 0.0  ;;  %v989_v40 = vsel %vm946_vm3, %v975_v22, 0.0  ;;  %1183 = vset.pattern.permute.xlu0 (!%p1134_p5), %v1196_v27  ;;  %v1026_v31 = vunpack.c.l.s4 (!%p1134_p5), %v1197_v55 }
 0x11e   : > { %v959_v10 = vadd.f32 %v958_v46, %v957_v51 }
 0x11f   : > { %v984_v42 = vadd.f32 %v983_v25, %v982_v39  ;;  %v1027_v11 = vunpack.c.0.s8 (!%p1134_p5), %v1026_v31 }
 0x120   : > { %v961_v44 = vadd.f32 %v960_v34, %v959_v10  ;;  %v1013_v5 = vld [vmem:[%s1591_s5] sm:$0xff] (!%p1134_p5)  ;;  %v1014_v30 = vld [vmem:[%s1591_s5 + $0x8] sm:$0xff] (!%p1134_p5)  ;;  %v1015_v2 = vld [vmem:[%s1591_s5 + $0x10] sm:$0xff] (!%p1134_p5) }
 0x121   : > { %v986_v53 = vadd.f32 %v985_v21, %v984_v42  ;;  %v1030_v6 = vsub.s32 (!%p1134_p5), %v1027_v11, %v1316_v61  ;;  %v1016_v32 = vld [vmem:[%s1591_s5 + $0x18] sm:$0xff] (!%p1134_p5)  ;;  %v1017_v61 = vld [vmem:[%s1591_s5 + $0x20] sm:$0xff] (!%p1134_p5)  ;;  %v1018_v13 = vld [vmem:[%s1591_s5 + $0x28] sm:$0xff] (!%p1134_p5) }
 0x122   : > { %962 = vadd.xlane.f32.xlu0 %v961_v44  ;;  %v1019_v18 = vld [vmem:[%s1591_s5 + $0x30] sm:$0xff] (!%p1134_p5)  ;;  %v1020_v23 = vld [vmem:[%s1591_s5 + $0x38] sm:$0xff] (!%p1134_p5) }
 0x123   : > { %v988_v3 = vadd.f32 %v987_v0, %v986_v53 }
 0x125   : > { %v990_v43 = vadd.f32 %v989_v40, %v988_v3 }
 0x127   : > { %991 = vadd.xlane.f32.xlu0 %v990_v43 }
 0x1af   : > { %v963_v26 = vpop.xlane.xlu0 %962 }
 0x1b0   : > { %v964_v58 = vadd.f32 %v963_v26, %v945_v57 }
 0x1b1   : > { %998 = sbr.rel (%p1134_p5) target bundleno = 610 (0x262), region = 48 }
 0x1b2   : > { %966 = vst.msk [vmem:[#allocation3] sm:$0xf] %vm965_vm4, %v964_v58 }
 0x1b4   : > { %v992_v60 = vpop.xlane.xlu0 %991 }
 0x1b5   : > { %v993_v14 = vadd.f32 %v992_v60, %v967_v48 }
 0x1b7   : > { %994 = vst.msk [vmem:[#allocation4] sm:$0xf] %vm965_vm4, %v993_v14 }
 0x1b9   : > { %v999_v49 = vld [vmem:[#allocation3] sm:$0xf] }
 0x1ba   : > { %v1000_v59 = vmul.f32 0.00048828125, %v999_v49 }
 0x1bc   : > { %v1003_v29 = vmul.f32 %v1000_v59, %v1000_v59 }
 0x1be   : > { %v1001_v63 = vld [vmem:[#allocation4] sm:$0xf] }
 0x1bf   : > { %v1002_v54 = vmul.f32 0.00048828125, %v1001_v63 }
 0x1c1   : > { %v1004_v62 = vsub.f32 %v1002_v54, %v1003_v29 }
 0x1c3   : > { %v1005_v4 = vmax.f32 %v1004_v62, 0.0 }
 0x1c5   : > { %v1007_v7 = vadd.f32 1e-05, %v1005_v4 }
 0x1c7   : > { %1184 = vrsqrt.f32 %v1007_v7 }
 0x1d1   : > { %v1185_v56 = vpop.eup %1184 }
 0x1d2   : > { %v1009_v8 = vmul.f32 %v1185_v56, %v1006_v15 }
 0x1d4   : > { %1023 = vperm.xlu0 %1183, %v1009_v8   ;;  %v1011_v1 = vmul.f32 %v1009_v8, %v1000_v59 }
 0x1d6   : > { %v1012_v19 = vsub.f32 %v1010_v9, %v1011_v1 }
 0x1d8   : > { %1043 = vperm.xlu0 %1183, %v1012_v19  }
 0x253   : > { %v1024_v20 = vpop.permute.xlu0 %1023 }
 0x254   : > { %v1031_v12 = vrot.slane %v1024_v20, %v1030_v6 }
 0x256   : > { %v1033_v33 = vmul.f32 %v1031_v12, %v1013_v5  ;;  %v1034_v38 = vmul.f32 %v1031_v12, %v1014_v30  ;;  %v1035_v28 = vmul.f32 %v1031_v12, %v1015_v2  ;;  %v1036_v41 = vmul.f32 %v1031_v12, %v1016_v32 }
 0x257   : > { %v1044_v16 = vpop.permute.xlu0 %1043  ;;  %v1037_v47 = vmul.f32 %v1031_v12, %v1017_v61  ;;  %v1038_v50 = vmul.f32 %v1031_v12, %v1018_v13  ;;  %v1039_v35 = vmul.f32 %v1031_v12, %v1019_v18  ;;  %v1040_v37 = vmul.f32 %v1031_v12, %v1020_v23 }
 0x258   : > { %v1051_v36 = vrot.slane %v1044_v16, %v1030_v6 }
 0x25a   : > { %v1053_v51 = vadd.f32 %v1051_v36, %v1033_v33  ;;  %v1054_v24 = vadd.f32 %v1051_v36, %v1034_v38  ;;  %v1055_v46 = vadd.f32 %v1051_v36, %v1035_v28  ;;  %v1056_v52 = vadd.f32 %v1051_v36, %v1036_v41 }
 0x25b   : > { %v1057_v10 = vadd.f32 %v1051_v36, %v1037_v47  ;;  %v1058_v17 = vadd.f32 %v1051_v36, %v1038_v50  ;;  %v1059_v25 = vadd.f32 %v1051_v36, %v1039_v35  ;;  %v1060_v34 = vadd.f32 %v1051_v36, %v1040_v37 }
 0x25c   : > { %v1061_v39 = vmax.f32 %v1053_v51, 0.0  ;;  %v1062_v44 = vmax.f32 %v1054_v24, 0.0  ;;  %v1063_v45 = vmax.f32 %v1055_v46, 0.0  ;;  %v1064_v21 = vmax.f32 %v1056_v52, 0.0 }
 0x25d   : > { %v1065_v42 = vmax.f32 %v1057_v10, 0.0  ;;  %v1066_v22 = vmax.f32 %v1058_v17, 0.0  ;;  %v1067_v53 = vmax.f32 %v1059_v25, 0.0  ;;  %v1068_v0 = vmax.f32 %v1060_v34, 0.0 }
 0x25e   : > { %1069 = vst [vmem:[%s1591_s5] sm:$0xff] %v1061_v39  ;;  %1070 = vst [vmem:[%s1591_s5 + $0x8] sm:$0xff] %v1062_v44 }
 0x25f   : > { %1071 = vst [vmem:[%s1591_s5 + $0x10] sm:$0xff] %v1063_v45  ;;  %1072 = vst [vmem:[%s1591_s5 + $0x18] sm:$0xff] %v1064_v21 }
 0x260   : > { %1073 = vst [vmem:[%s1591_s5 + $0x20] sm:$0xff] %v1065_v42  ;;  %1074 = vst [vmem:[%s1591_s5 + $0x28] sm:$0xff] %v1066_v22 }
 0x261   : > { %1075 = vst [vmem:[%s1591_s5 + $0x30] sm:$0xff] %v1067_v53  ;;  %1076 = vst [vmem:[%s1591_s5 + $0x38] sm:$0xff] %v1068_v0 }
 0x262 PF: > { %s15_s18 = sadd.s32 1, %s1192_s18  }
 0x263   : > { %p12_p6 = scmp.ge.s32.totalorder %s15_s18, 4  }
 0x265   :  { %14 = sbr.rel (!%p12_p6) target bundleno = 1 (0x1), region = 78 }

</bundles_post_ra>
